<compile_context>
chip_gen: v6e
topology: v6e:2x2x1
jax: 0.10.0
libtpu: 0.0.40
codegen_flags: <defaults>
</compile_context>

<pallas_src>
import jax
import jax.numpy as jnp
from jax.experimental import pallas as pl
from jax.experimental.pallas import tpu as pltpu

# Model sizes implied by the module (small, TPU-friendly picks)
NUM_INPUTS = 64
NUM_HIDDENS = 128
NUM_OUTPUTS = 16
MAX_TILE_M = 1024   # cap on batch rows per grid step (VMEM use stays << limits)


def mlp_kernel(x_ref, w1_ref, b1_ref, w2_ref, b2_ref, w3_ref, b3_ref, o_ref):
    # In-kernel bf16 cast of the f32 input tile (avoids a separate XLA cast pass over HBM).
    x = x_ref[...].astype(jnp.bfloat16)
    # hidden1 + relu1 : (TM, 64) bf16 @ (64, 128) bf16 -> f32 accumulate
    h1 = jnp.dot(x, w1_ref[...], preferred_element_type=jnp.float32)
    h1 = jnp.maximum(h1 + b1_ref[...], 0.0).astype(jnp.bfloat16)
    # hidden2 + relu2 : (TM, 128) @ (128, 128)
    h2 = jnp.dot(h1, w2_ref[...], preferred_element_type=jnp.float32)
    h2 = jnp.maximum(h2 + b2_ref[...], 0.0).astype(jnp.bfloat16)
    # output (no activation), stored unpadded at 16 lanes -> 8x less writeback than 128-lane pad
    out = jnp.dot(h2, w3_ref[...], preferred_element_type=jnp.float32)
    o_ref[...] = (out + b3_ref[...]).astype(o_ref.dtype)


def prepare_params(params):
    """One-time layout conversion, hoisted out of the per-call forward path:
    transpose PyTorch (out, in) weights to (in, out) and cast matmul operands to bf16;
    biases stay f32 (added post-accumulation)."""
    w1 = params["w1"].T.astype(jnp.bfloat16)                       # (64, 128)
    w2 = params["w2"].T.astype(jnp.bfloat16)                       # (128, 128)
    w3 = params["w3"].T.astype(jnp.bfloat16)                       # (128, 16)
    b1 = params["b1"].reshape(1, NUM_HIDDENS).astype(jnp.float32)
    b2 = params["b2"].reshape(1, NUM_HIDDENS).astype(jnp.float32)
    b3 = params["b3"].reshape(1, NUM_OUTPUTS).astype(jnp.float32)
    return (w1, b1, w2, b2, w3, b3)


def _choose_tile_m(batch):
    """Large tile to amortize per-step overhead, but keep >=2 grid steps when the batch
    allows it so v7x's 2 TensorCores are both used (no-op constraint on v5e/v6e)."""
    half = -(-batch // 2)                       # ceil(B/2)
    tile = ((half + 127) // 128) * 128          # round up to 128-row multiple
    return max(128, min(MAX_TILE_M, tile))


@jax.jit
def classification_forward(x, prepared):
    """x: (B, NUM_INPUTS) f32. prepared: output of prepare_params (bf16 (in,out) weights)."""
    w1, b1, w2, b2, w3, b3 = prepared
    B = x.shape[0]
    tile_m = _choose_tile_m(B)
    Bp = pl.cdiv(B, tile_m) * tile_m
    if Bp != B:
        x = jnp.pad(x, ((0, Bp - B), (0, 0)))

    const = lambda i: (0, 0)  # weights/biases: DMA once, resident in VMEM across all batch tiles
    flops = 2 * Bp * (NUM_INPUTS * NUM_HIDDENS
                      + NUM_HIDDENS * NUM_HIDDENS
                      + NUM_HIDDENS * NUM_OUTPUTS)
    bytes_accessed = (Bp * NUM_INPUTS * 4                                   # x (f32 in)
                      + (NUM_INPUTS * NUM_HIDDENS + NUM_HIDDENS * NUM_HIDDENS
                         + NUM_HIDDENS * NUM_OUTPUTS) * 2                   # bf16 weights
                      + (2 * NUM_HIDDENS + NUM_OUTPUTS) * 4                 # f32 biases
                      + Bp * NUM_OUTPUTS * 4)                               # f32 out
    out = pl.pallas_call(
        mlp_kernel,
        out_shape=jax.ShapeDtypeStruct((Bp, NUM_OUTPUTS), jnp.float32),
        grid=(Bp // tile_m,),
        in_specs=[
            pl.BlockSpec((tile_m, NUM_INPUTS), lambda i: (i, 0)),
            pl.BlockSpec((NUM_INPUTS, NUM_HIDDENS), const),
            pl.BlockSpec((1, NUM_HIDDENS), const),
            pl.BlockSpec((NUM_HIDDENS, NUM_HIDDENS), const),
            pl.BlockSpec((1, NUM_HIDDENS), const),
            pl.BlockSpec((NUM_HIDDENS, NUM_OUTPUTS), const),
            pl.BlockSpec((1, NUM_OUTPUTS), const),
        ],
        out_specs=pl.BlockSpec((tile_m, NUM_OUTPUTS), lambda i: (i, 0)),
        compiler_params=pltpu.CompilerParams(
            dimension_semantics=("parallel",)),  # shards batch tiles across v7x's 2 TCs
        cost_estimate=pl.CostEstimate(flops=flops, transcendentals=0,
                                      bytes_accessed=bytes_accessed),
    )(x, w1, b1, w2, b2, w3, b3)
    if Bp != B:
        out = out[:B]
    return out


def init_params(key):
    """Deterministic init mimicking torch.nn.Linear default (uniform +/- 1/sqrt(fan_in)),
    stored in PyTorch (out, in) layout / f32 — layout conversion happens once in prepare_params."""
    ks = jax.random.split(key, 6)

    def lin(kw, kb, out_f, in_f):
        bound = 1.0 / jnp.sqrt(in_f)
        w = jax.random.uniform(kw, (out_f, in_f), jnp.float32, -bound, bound)
        b = jax.random.uniform(kb, (out_f,), jnp.float32, -bound, bound)
        return w, b

    w1, b1 = lin(ks[0], ks[1], NUM_HIDDENS, NUM_INPUTS)
    w2, b2 = lin(ks[2], ks[3], NUM_HIDDENS, NUM_HIDDENS)
    w3, b3 = lin(ks[4], ks[5], NUM_OUTPUTS, NUM_HIDDENS)
    return {"w1": w1, "b1": b1, "w2": w2, "b2": b2, "w3": w3, "b3": b3}


if __name__ == "__main__":
    key = jax.random.PRNGKey(0)
    k_x, k_p = jax.random.split(key)
    BATCH = 256  # two 128-row grid steps; weights loaded once and reused
    x = jax.random.normal(k_x, (BATCH, NUM_INPUTS), jnp.float32)
    params = init_params(k_p)
    prepared = prepare_params(params)          # one-time layout/dtype conversion

    out = classification_forward(x, prepared)
    jax.block_until_ready(out)

    # Reference check (plain JAX, f32, original PyTorch semantics).
    # Tolerance loosened because matmul inputs are bf16 (accumulation stays f32).
    h1 = jnp.maximum(x @ params["w1"].T + params["b1"], 0.0)
    h2 = jnp.maximum(h1 @ params["w2"].T + params["b2"], 0.0)
    ref = h2 @ params["w3"].T + params["b3"]
    assert out.shape == (BATCH, NUM_OUTPUTS)
    assert jnp.allclose(out, ref, atol=3e-2, rtol=3e-2)

    print("KERNEL_OK")
</pallas_src>

<mosaic_0001>
module attributes {stable_mosaic.version = 11 : i64} {
  func.func @mlp_kernel(%arg0: i32, %arg1: memref<128x64xf32, #tpu.memory_space<vmem>>, %arg2: memref<64x128xbf16, #tpu.memory_space<vmem>>, %arg3: memref<1x128xf32, #tpu.memory_space<vmem>>, %arg4: memref<128x128xbf16, #tpu.memory_space<vmem>>, %arg5: memref<1x128xf32, #tpu.memory_space<vmem>>, %arg6: memref<128x16xbf16, #tpu.memory_space<vmem>>, %arg7: memref<1x16xf32, #tpu.memory_space<vmem>>, %arg8: memref<128x16xf32, #tpu.memory_space<vmem>>) attributes {dimension_semantics = [#tpu.dimension_semantics<parallel>], iteration_bounds = array<i64: 2>, scalar_prefetch = 0 : i64, scratch_operands = 0 : i64, tpu.core_type = #tpu.core_type<tc>, window_params = [{transform_indices = @transform_0, window_bounds = array<i64: 128, 64>}, {pipeline_mode = #tpu.pipeline_mode<synchronous>, transform_indices = @transform_1, window_bounds = array<i64: 64, 128>}, {pipeline_mode = #tpu.pipeline_mode<synchronous>, transform_indices = @transform_2, window_bounds = array<i64: 1, 128>}, {pipeline_mode = #tpu.pipeline_mode<synchronous>, transform_indices = @transform_3, window_bounds = array<i64: 128, 128>}, {pipeline_mode = #tpu.pipeline_mode<synchronous>, transform_indices = @transform_4, window_bounds = array<i64: 1, 128>}, {pipeline_mode = #tpu.pipeline_mode<synchronous>, transform_indices = @transform_5, window_bounds = array<i64: 128, 16>}, {pipeline_mode = #tpu.pipeline_mode<synchronous>, transform_indices = @transform_6, window_bounds = array<i64: 1, 16>}, {transform_indices = @transform_7, window_bounds = array<i64: 128, 16>}]} {
    %c0 = arith.constant 0 : index
    %c0_0 = arith.constant 0 : index
    %0 = vector.load %arg1[%c0, %c0_0] : memref<128x64xf32, #tpu.memory_space<vmem>>, vector<128x64xf32>
    %1 = arith.truncf %0 : vector<128x64xf32> to vector<128x64xbf16>
    %c0_1 = arith.constant 0 : index
    %c0_2 = arith.constant 0 : index
    %2 = vector.load %arg2[%c0_1, %c0_2] : memref<64x128xbf16, #tpu.memory_space<vmem>>, vector<64x128xbf16>
    %cst = arith.constant dense<0.000000e+00> : vector<128x128xf32>
    %3 = tpu.matmul %1, %2, %cst {dimension_numbers = #tpu.dot_dimension_numbers<[1], [0], [0], [1], [0, 0, 1, 1], [], []>} : vector<128x64xbf16>, vector<64x128xbf16>, vector<128x128xf32> -> vector<128x128xf32>
    %c0_3 = arith.constant 0 : index
    %c0_4 = arith.constant 0 : index
    %4 = vector.load %arg3[%c0_3, %c0_4] : memref<1x128xf32, #tpu.memory_space<vmem>>, vector<1x128xf32>
    %5 = vector.broadcast %4 : vector<1x128xf32> to vector<128x128xf32>
    %6 = arith.addf %3, %5 : vector<128x128xf32>
    %cst_5 = arith.constant 0.000000e+00 : f32
    %7 = vector.broadcast %cst_5 : f32 to vector<128x128xf32>
    %8 = arith.maximumf %6, %7 : vector<128x128xf32>
    %9 = arith.truncf %8 : vector<128x128xf32> to vector<128x128xbf16>
    %c0_6 = arith.constant 0 : index
    %c0_7 = arith.constant 0 : index
    %10 = vector.load %arg4[%c0_6, %c0_7] : memref<128x128xbf16, #tpu.memory_space<vmem>>, vector<128x128xbf16>
    %cst_8 = arith.constant dense<0.000000e+00> : vector<128x128xf32>
    %11 = tpu.matmul %9, %10, %cst_8 {dimension_numbers = #tpu.dot_dimension_numbers<[1], [0], [0], [1], [0, 0, 1, 1], [], []>} : vector<128x128xbf16>, vector<128x128xbf16>, vector<128x128xf32> -> vector<128x128xf32>
    %c0_9 = arith.constant 0 : index
    %c0_10 = arith.constant 0 : index
    %12 = vector.load %arg5[%c0_9, %c0_10] : memref<1x128xf32, #tpu.memory_space<vmem>>, vector<1x128xf32>
    %13 = vector.broadcast %12 : vector<1x128xf32> to vector<128x128xf32>
    %14 = arith.addf %11, %13 : vector<128x128xf32>
    %cst_11 = arith.constant 0.000000e+00 : f32
    %15 = vector.broadcast %cst_11 : f32 to vector<128x128xf32>
    %16 = arith.maximumf %14, %15 : vector<128x128xf32>
    %17 = arith.truncf %16 : vector<128x128xf32> to vector<128x128xbf16>
    %c0_12 = arith.constant 0 : index
    %c0_13 = arith.constant 0 : index
    %18 = vector.load %arg6[%c0_12, %c0_13] : memref<128x16xbf16, #tpu.memory_space<vmem>>, vector<128x16xbf16>
    %cst_14 = arith.constant dense<0.000000e+00> : vector<128x16xf32>
    %19 = tpu.matmul %17, %18, %cst_14 {dimension_numbers = #tpu.dot_dimension_numbers<[1], [0], [0], [1], [0, 0, 1, 1], [], []>} : vector<128x128xbf16>, vector<128x16xbf16>, vector<128x16xf32> -> vector<128x16xf32>
    %c0_15 = arith.constant 0 : index
    %c0_16 = arith.constant 0 : index
    %20 = vector.load %arg7[%c0_15, %c0_16] : memref<1x16xf32, #tpu.memory_space<vmem>>, vector<1x16xf32>
    %21 = vector.broadcast %20 : vector<1x16xf32> to vector<128x16xf32>
    %22 = arith.addf %19, %21 : vector<128x16xf32>
    %c0_17 = arith.constant 0 : index
    %c0_18 = arith.constant 0 : index
    %23 = vector.load %arg8[%c0_17, %c0_18] : memref<128x16xf32, #tpu.memory_space<vmem>>, vector<128x16xf32>
    tpu.vector_store %arg8[%c0_17, %c0_18], %22 {strides = array<i32>} : memref<128x16xf32, #tpu.memory_space<vmem>>, vector<128x16xf32>,
    return
  }
  func.func @transform_0(%arg0: i32) -> (i32, i32) {
    %c0_i32 = arith.constant 0 : i32
    %c0_i32_0 = arith.constant 0 : i32
    return %arg0, %c0_i32 : i32, i32
  }
  func.func @transform_1(%arg0: i32) -> (i32, i32) {
    %c0_i32 = arith.constant 0 : i32
    %c0_i32_0 = arith.constant 0 : i32
    %c0_i32_1 = arith.constant 0 : i32
    return %c0_i32, %c0_i32_0 : i32, i32
  }
  func.func @transform_2(%arg0: i32) -> (i32, i32) {
    %c0_i32 = arith.constant 0 : i32
    %c0_i32_0 = arith.constant 0 : i32
    %c0_i32_1 = arith.constant 0 : i32
    return %c0_i32, %c0_i32_0 : i32, i32
  }
  func.func @transform_3(%arg0: i32) -> (i32, i32) {
    %c0_i32 = arith.constant 0 : i32
    %c0_i32_0 = arith.constant 0 : i32
    %c0_i32_1 = arith.constant 0 : i32
    return %c0_i32, %c0_i32_0 : i32, i32
  }
  func.func @transform_4(%arg0: i32) -> (i32, i32) {
    %c0_i32 = arith.constant 0 : i32
    %c0_i32_0 = arith.constant 0 : i32
    %c0_i32_1 = arith.constant 0 : i32
    return %c0_i32, %c0_i32_0 : i32, i32
  }
  func.func @transform_5(%arg0: i32) -> (i32, i32) {
    %c0_i32 = arith.constant 0 : i32
    %c0_i32_0 = arith.constant 0 : i32
    %c0_i32_1 = arith.constant 0 : i32
    return %c0_i32, %c0_i32_0 : i32, i32
  }
  func.func @transform_6(%arg0: i32) -> (i32, i32) {
    %c0_i32 = arith.constant 0 : i32
    %c0_i32_0 = arith.constant 0 : i32
    %c0_i32_1 = arith.constant 0 : i32
    return %c0_i32, %c0_i32_0 : i32, i32
  }
  func.func @transform_7(%arg0: i32) -> (i32, i32) {
    %c0_i32 = arith.constant 0 : i32
    %c0_i32_0 = arith.constant 0 : i32
    return %arg0, %c0_i32 : i32, i32
  }
}

</mosaic_0001>

<bundles_post_ra>
// kernel: classification_forward.1
= control target key start
LH: loop header
LB: loop body
LE: loop exit
PB: predicated region body
PF: predicated region fallthrough
CT: control target
= control target key end

     0   :  { %s1191_s24 = smov 0   ;;  %s1350_s0 = inlined_call_operand.vmem [shape: f32[256,64], index: 0, kind: input, shape index: {}]   ;;  %s1351_s1 = inlined_call_operand.vmem [shape: bf16[64,128], index: 1, kind: input, shape index: {}]   ;;  %s1352_s2 = inlined_call_operand.vmem [shape: f32[1,128], index: 2, kind: input, shape index: {}]   ;;  %s1353_s3 = inlined_call_operand.vmem [shape: bf16[128,128], index: 3, kind: input, shape index: {}]   ;;  %s1354_s4 = inlined_call_operand.vmem [shape: f32[1,128], index: 4, kind: input, shape index: {}]   ;;  %s1355_s5 = inlined_call_operand.vmem [shape: bf16[128,16], index: 5, kind: input, shape index: {}]   ;;  %s1356_s6 = inlined_call_operand.vmem [shape: f32[1,16], index: 6, kind: input, shape index: {}]   ;;  %s1357_s7 = inlined_call_operand.vmem [shape: f32[256,16], index: 7, kind: output, shape index: {}]  }
   0x1 LB: > { %s925_s25 = sadd.s32 4294967295, %s1149_s24   ;;  %p929_p0 = scmp.ge.s32.totalorder %s1149_s24, 1  ;;  %s1149_s24 = sphi %s1191_s24, %s17_s24  }
   0x2   : > { %p238_p1 = scmp.lt.s32.totalorder %s1149_s24, 3 }
   0x4   : > { %p239_p2 = pnand %p929_p0, %p238_p1 }
   0x5   : > { %s930_s28 = sshll.u32 (!%p239_p2), %s925_s25, 4 }
   0x6   : > { %242 = sbr.rel (%p239_p2) target bundleno = 666 (0x29a), region = 48  ;;  %p271_p3 = scmp.lt.s32.totalorder (!%p239_p2), %s930_s28, 31 }
   0xb   : > { %v1123_v0 = vld [vmem:[%s1351_s1 + $0x18] sm:$0xff]   ;;  %v1124_v1 = vld [vmem:[%s1351_s1 + $0x10] sm:$0xff]   ;;  %v1125_v2 = vld [vmem:[%s1351_s1 + $0x8] sm:$0xff]   ;;  %s1359_s28 = smov (!%p271_p3, %s930_s28), 31  ;;  %vm346_vm0 = vcmask 523264   ;;  %vm852_vm1 = vcmask 130048  }
   0xc   : > { %1011 = vmatprep.subr.bf16.mxu0 %v1123_v0  ;;  %v1127_v3 = vld [vmem:[%s1353_s3 + $0x38] sm:$0xff]   ;;  %s931_s12 = sshll.u32 %s1359_s28, 3  ;;  %v1128_v4 = vld [vmem:[%s1353_s3 + $0x30] sm:$0xff]   ;;  %v1126_v7 = vld [vmem:[%s1351_s1] sm:$0xff]  }
   0xd   : > { %1012 = vmatpush3.bf16.msra.mxu0 %v1123_v0  ;;  %s1222_s17 = scalar_lea.vmem %s1350_s0, %s931_s12  ;;  %1035 = vmatprep.subr.bf16.mxu1 %v1127_v3  ;;  %v1129_v9 = vld [vmem:[%s1353_s3 + $0x28] sm:$0xff]   ;;  %v1130_v14 = vld [vmem:[%s1353_s3 + $0x20] sm:$0xff]   ;;  %v1131_v16 = vld [vmem:[%s1353_s3 + $0x18] sm:$0xff]   ;;  %s1313_s16 = scalar_lea.vmem %s1357_s7, %s931_s12 }
   0xe   : > { %1013 = vmatprep.subr.bf16.mxu0 %v1124_v1  ;;  %v283_v5 = vld [vmem:[%s1222_s17] sm:$0xff]  ;;  %v284_v6 = vld [vmem:[%s1222_s17 + $0x8] sm:$0xff]  ;;  %1036 = vmatpush3.bf16.msra.mxu1 %v1127_v3  ;;  %v285_v10 = vld [vmem:[%s1222_s17 + $0x10] sm:$0xff] }
   0xf   : > { %v299_v8 = vpack.c.bf16 %v284_v6, %v283_v5  ;;  %1037 = vmatprep.subr.bf16.mxu1 %v1128_v4  ;;  %v286_v11 = vld [vmem:[%s1222_s17 + $0x18] sm:$0xff]  ;;  %v287_v12 = vld [vmem:[%s1222_s17 + $0x20] sm:$0xff]  ;;  %v288_v13 = vld [vmem:[%s1222_s17 + $0x28] sm:$0xff] }
  0x10   : > { %v300_v15 = vpack.c.bf16 %v286_v11, %v285_v10  ;;  %v301_v17 = vpack.c.bf16 %v288_v13, %v287_v12  ;;  %v289_v18 = vld [vmem:[%s1222_s17 + $0x30] sm:$0xff]  ;;  %v290_v19 = vld [vmem:[%s1222_s17 + $0x38] sm:$0xff]  ;;  %v291_v20 = vld [vmem:[%s1222_s17 + $0x40] sm:$0xff] }
  0x11   : > { %1014 = vmatpush3.bf16.msra.mxu0 %v1124_v1  ;;  %1019 = vmatprep.mubr.msk.bf16.mxu0 %vm346_vm0, %v299_v8  ;;  %v292_v21 = vld [vmem:[%s1222_s17 + $0x48] sm:$0xff]  ;;  %v302_v22 = vpack.c.bf16 %v290_v19, %v289_v18  ;;  %v293_v24 = vld [vmem:[%s1222_s17 + $0x50] sm:$0xff]  ;;  %v294_v25 = vld [vmem:[%s1222_s17 + $0x58] sm:$0xff] }
  0x12   : > { %1015 = vmatprep.subr.bf16.mxu0 %v1125_v2  ;;  %1038 = vmatpush3.bf16.msra.mxu1 %v1128_v4  ;;  %v303_v23 = vpack.c.bf16 %v292_v21, %v291_v20  ;;  %v295_v26 = vld [vmem:[%s1222_s17 + $0x60] sm:$0xff]  ;;  %v296_v27 = vld [vmem:[%s1222_s17 + $0x68] sm:$0xff]  ;;  %v304_v28 = vpack.c.bf16 %v294_v25, %v293_v24  ;;  %v297_v30 = vld [vmem:[%s1222_s17 + $0x70] sm:$0xff] }
  0x13   : > { %1039 = vmatprep.subr.bf16.mxu1 %v1129_v9  ;;  %v305_v29 = vpack.c.bf16 %v296_v27, %v295_v26  ;;  %v298_v31 = vld [vmem:[%s1222_s17 + $0x78] sm:$0xff]  ;;  %v1132_v33 = vld [vmem:[%s1353_s3 + $0x10] sm:$0xff]   ;;  %v1133_v34 = vld [vmem:[%s1353_s3 + $0x8] sm:$0xff]  }
  0x14   : > { %v306_v32 = vpack.c.bf16 %v298_v31, %v297_v30  ;;  %v1134_v35 = vld [vmem:[%s1353_s3] sm:$0xff]   ;;  %v1135_v36 = vld [vmem:[%s1355_s5 + $0x38] sm:$0xff]   ;;  %v1136_v37 = vld [vmem:[%s1355_s5 + $0x30] sm:$0xff]  }
  0x15   : > { %1016 = vmatpush3.bf16.msra.mxu0 %v1125_v2  ;;  %v1137_v38 = vld [vmem:[%s1355_s5 + $0x28] sm:$0xff]   ;;  %v1138_v39 = vld [vmem:[%s1355_s5 + $0x20] sm:$0xff]   ;;  %v1284_v40 = vld [vmem:[%s1355_s5 + $0x18] sm:$0xff]  }
  0x16   : > { %1017 = vmatprep.subr.bf16.mxu0 %v1126_v7  ;;  %1040 = vmatpush3.bf16.msra.mxu1 %v1129_v9  ;;  %v934_v43 = vld [vmem:[%s1352_s2] ss:$0 sm:$0xff] }
  0x17   : > { %1041 = vmatprep.subr.bf16.mxu1 %v1130_v14 }
  0x19   : > { %1018 = vmatpush3.bf16.msra.mxu0 %v1126_v7 }
  0x1a   : > { %1042 = vmatpush3.bf16.msra.mxu1 %v1130_v14  ;;  %1067 = vmatprep.subr.bf16.mxu0 %v1135_v36 }
  0x1b   : > { %1043 = vmatprep.subr.bf16.mxu1 %v1131_v16 }
  0x1c   : > { %1020 = vmatmul.mubr.msk.bf16.vlgmr.msra.gmra.mxu0 %vm346_vm0, %v300_v15 }
  0x1d   : > { %1023 = vmatprep.mubr.msk.bf16.mxu0 %vm346_vm0, %v301_v17  ;;  %1068 = vmatpush3.bf16.msra.mxu0 %v1135_v36 }
  0x1e   : > { %1044 = vmatpush3.bf16.msra.mxu1 %v1131_v16  ;;  %1069 = vmatprep.subr.bf16.mxu0 %v1136_v37 }
  0x1f   : > { %1045 = vmatprep.subr.bf16.mxu1 %v1132_v33 }
  0x21   : > { %1070 = vmatpush3.bf16.msra.mxu0 %v1136_v37 }
  0x22   : > { %1046 = vmatpush3.bf16.msra.mxu1 %v1132_v33  ;;  %1071 = vmatprep.subr.bf16.mxu0 %v1137_v38 }
  0x23   : > { %1047 = vmatprep.subr.bf16.mxu1 %v1133_v34 }
  0x24   : > { %1024 = vmatmul.mubr.msk.bf16.gmra.mxu0 %vm346_vm0, %v302_v22 }
  0x25   : > { %1027 = vmatprep.mubr.msk.bf16.mxu0 %vm346_vm0, %v303_v23  ;;  %1072 = vmatpush3.bf16.msra.mxu0 %v1137_v38 }
  0x26   : > { %1048 = vmatpush3.bf16.msra.mxu1 %v1133_v34  ;;  %1073 = vmatprep.subr.bf16.mxu0 %v1138_v39  ;;  %v1140_v34 = vld [vmem:[%s1355_s5 + $0x10] sm:$0xff]  }
  0x27   : > { %1049 = vmatprep.subr.bf16.mxu1 %v1134_v35 }
  0x29   : > { %1074 = vmatpush3.bf16.msra.mxu0 %v1138_v39 }
  0x2a   : > { %1050 = vmatpush3.bf16.msra.mxu1 %v1134_v35  ;;  %1075 = vmatprep.subr.bf16.mxu0 %v1284_v40  ;;  %v1141_v35 = vld [vmem:[%s1355_s5 + $0x8] sm:$0xff]  }
  0x2b   : > { %1099 = vmatprep.subr.bf16.mxu1 %v1135_v36 }
  0x2c   : > { %1028 = vmatmul.mubr.msk.bf16.gmra.mxu0 %vm346_vm0, %v304_v28 }
  0x2d   : > { %1031 = vmatprep.mubr.msk.bf16.mxu0 %vm346_vm0, %v305_v29  ;;  %1076 = vmatpush3.bf16.msra.mxu0 %v1284_v40 }
  0x2e   : > { %1077 = vmatprep.subr.bf16.mxu0 %v1140_v34 }
  0x31   : > { %1078 = vmatpush3.bf16.msra.mxu0 %v1140_v34 }
  0x32   : > { %1079 = vmatprep.subr.bf16.mxu0 %v1141_v35 }
  0x34   : > { %1032 = vmatmul.mubr.msk.bf16.gmra.mxu0 %vm346_vm0, %v306_v32 }
  0x35   : > { %1080 = vmatpush3.bf16.msra.mxu0 %v1141_v35 }
  0xdc   : > { %v1021_v41 = vpop.f32.mrf.mxu0 }
  0xdd   : > { %v414_v47 = vadd.f32 %v1021_v41, %v934_v43 }
  0xde   : > { %v405_v42 = vpop.f32.mrf.mxu0 }
  0xdf   : > { %v406_v45 = vadd.f32 %v934_v43, %v405_v42  ;;  %v470_v54 = vmax.f32 %v414_v47, 0.0 }
  0xe0   : > { %v1022_v44 = vpop.f32.mrf.mxu0 }
  0xe1   : > { %v417_v46 = vadd.f32 %v1022_v44, %v934_v43  ;;  %v468_v52 = vmax.f32 %v406_v45, 0.0 }
  0xe2   : > { %v408_v48 = vpop.f32.mrf.mxu0 }
  0xe3   : > { %v409_v49 = vadd.f32 %v934_v43, %v408_v48  ;;  %v471_v50 = vmax.f32 %v417_v46, 0.0 }
  0xe4   : > { %v1025_v51 = vpop.f32.mrf.mxu0 }
  0xe5   : > { %v469_v53 = vmax.f32 %v409_v49, 0.0  ;;  %v485_v57 = vpack.c.bf16 %v471_v50, %v470_v54  ;;  %v430_v61 = vadd.f32 %v1025_v51, %v934_v43 }
  0xe6   : > { %v421_v55 = vpop.f32.mrf.mxu0 }
  0xe7   : > { %v484_v56 = vpack.c.bf16 %v469_v53, %v468_v52  ;;  %v422_v59 = vadd.f32 %v934_v43, %v421_v55  ;;  %v474_v4 = vmax.f32 %v430_v61, 0.0 }
  0xe8   : > { %v1026_v58 = vpop.f32.mrf.mxu0 }
  0xe9   : > { %v433_v60 = vadd.f32 %v1026_v58, %v934_v43  ;;  %1051 = vmatprep.mubr.bf16.mxu1 %v484_v56  ;;  %v472_v2 = vmax.f32 %v422_v59, 0.0 }
  0xea   : > { %v424_v62 = vpop.f32.mrf.mxu0  ;;  %1052 = vmatmul.mubr.bf16.vlgmr.msra.gmra.mxu1 %v485_v57 }
  0xeb   : > { %v425_v63 = vadd.f32 %v934_v43, %v424_v62  ;;  %1107 = vmatpush3.bf16.msra.mxu1 %v1135_v36  ;;  %v475_v0 = vmax.f32 %v433_v60, 0.0  ;;  %v1142_v36 = vld [vmem:[%s1355_s5] sm:$0xff]  }
  0xec   : > { %v1029_v1 = vpop.f32.mrf.mxu0  ;;  %1100 = vmatprep.subr.bf16.mxu1 %v1136_v37  ;;  %1081 = vmatprep.subr.bf16.mxu0 %v1142_v36 }
  0xed   : > { %v473_v3 = vmax.f32 %v425_v63, 0.0  ;;  %v487_v7 = vpack.c.bf16 %v475_v0, %v474_v4  ;;  %v446_v11 = vadd.f32 %v1029_v1, %v934_v43  ;;  %1082 = vmatpush3.bf16.msra.mxu0 %v1142_v36 }
  0xee   : > { %v437_v5 = vpop.f32.mrf.mxu0 }
  0xef   : > { %v486_v6 = vpack.c.bf16 %v473_v3, %v472_v2  ;;  %1108 = vmatpush3.bf16.msra.mxu1 %v1136_v37  ;;  %v438_v9 = vadd.f32 %v934_v43, %v437_v5  ;;  %v478_v18 = vmax.f32 %v446_v11, 0.0 }
  0xf0   : > { %v1030_v8 = vpop.f32.mrf.mxu0  ;;  %1101 = vmatprep.subr.bf16.mxu1 %v1137_v38 }
  0xf1   : > { %v449_v10 = vadd.f32 %v1030_v8, %v934_v43  ;;  %1055 = vmatprep.mubr.bf16.mxu1 %v486_v6  ;;  %v476_v16 = vmax.f32 %v438_v9, 0.0 }
  0xf2   : > { %v440_v12 = vpop.f32.mrf.mxu0  ;;  %1056 = vmatmul.mubr.bf16.gmra.mxu1 %v487_v7 }
  0xf3   : > { %v441_v13 = vadd.f32 %v934_v43, %v440_v12  ;;  %1109 = vmatpush3.bf16.msra.mxu1 %v1137_v38  ;;  %v479_v14 = vmax.f32 %v449_v10, 0.0 }
  0xf4   : > { %v1033_v15 = vpop.f32.mrf.mxu0  ;;  %1102 = vmatprep.subr.bf16.mxu1 %v1138_v39 }
  0xf5   : > { %v477_v17 = vmax.f32 %v441_v13, 0.0  ;;  %v489_v21 = vpack.c.bf16 %v479_v14, %v478_v18  ;;  %v462_v25 = vadd.f32 %v1033_v15, %v934_v43 }
  0xf6   : > { %v453_v19 = vpop.f32.mrf.mxu0 }
  0xf7   : > { %v488_v20 = vpack.c.bf16 %v477_v17, %v476_v16  ;;  %1110 = vmatpush3.bf16.msra.mxu1 %v1138_v39  ;;  %v454_v23 = vadd.f32 %v934_v43, %v453_v19  ;;  %v482_v31 = vmax.f32 %v462_v25, 0.0  ;;  %v947_v39 = vld [vmem:[%s1354_s4] ss:$0 sm:$0xff] }
  0xf8   : > { %v1034_v22 = vpop.f32.mrf.mxu0  ;;  %1103 = vmatprep.subr.bf16.mxu1 %v1284_v40 }
  0xf9   : > { %v465_v24 = vadd.f32 %v1034_v22, %v934_v43  ;;  %1059 = vmatprep.mubr.bf16.mxu1 %v488_v20  ;;  %v480_v29 = vmax.f32 %v454_v23, 0.0 }
  0xfa   : > { %v456_v26 = vpop.f32.mrf.mxu0  ;;  %1060 = vmatmul.mubr.bf16.gmra.mxu1 %v489_v21 }
  0xfb   : > { %v457_v27 = vadd.f32 %v934_v43, %v456_v26  ;;  %1111 = vmatpush3.bf16.msra.mxu1 %v1284_v40  ;;  %v483_v28 = vmax.f32 %v465_v24, 0.0 }
  0xfc   : > { %1104 = vmatprep.subr.bf16.mxu1 %v1140_v34 }
  0xfd   : > { %v481_v30 = vmax.f32 %v457_v27, 0.0  ;;  %v491_v33 = vpack.c.bf16 %v483_v28, %v482_v31 }
  0xff   : > { %v490_v32 = vpack.c.bf16 %v481_v30, %v480_v29  ;;  %1112 = vmatpush3.bf16.msra.mxu1 %v1140_v34  ;;  %v956_v30 = vld [vmem:[%s1356_s6] ss:$0 sm:$0xff] }
 0x100   : > { %1105 = vmatprep.subr.bf16.mxu1 %v1141_v35 }
 0x101   : > { %1063 = vmatprep.mubr.bf16.mxu1 %v490_v32 }
 0x102   : > { %1064 = vmatmul.mubr.bf16.gmra.mxu1 %v491_v33 }
 0x103   : > { %1113 = vmatpush3.bf16.msra.mxu1 %v1141_v35 }
 0x104   : > { %1106 = vmatprep.subr.bf16.mxu1 %v1142_v36 }
 0x107   : > { %1114 = vmatpush3.bf16.msra.mxu1 %v1142_v36 }
 0x1aa   : > { %v1053_v37 = vpop.f32.mrf.mxu1 }
 0x1ab   : > { %v606_v43 = vadd.f32 %v1053_v37, %v947_v39 }
 0x1ac   : > { %v597_v38 = vpop.f32.mrf.mxu1 }
 0x1ad   : > { %v598_v41 = vadd.f32 %v947_v39, %v597_v38  ;;  %v662_v50 = vmax.f32 %v606_v43, 0.0 }
 0x1ae   : > { %v1054_v40 = vpop.f32.mrf.mxu1 }
 0x1af   : > { %v609_v42 = vadd.f32 %v1054_v40, %v947_v39  ;;  %v660_v48 = vmax.f32 %v598_v41, 0.0 }
 0x1b0   : > { %v600_v44 = vpop.f32.mrf.mxu1 }
 0x1b1   : > { %v601_v45 = vadd.f32 %v947_v39, %v600_v44  ;;  %v663_v46 = vmax.f32 %v609_v42, 0.0 }
 0x1b2   : > { %v1057_v47 = vpop.f32.mrf.mxu1 }
 0x1b3   : > { %v661_v49 = vmax.f32 %v601_v45, 0.0  ;;  %v677_v53 = vpack.c.bf16 %v663_v46, %v662_v50  ;;  %v622_v57 = vadd.f32 %v1057_v47, %v947_v39 }
 0x1b4   : > { %v613_v51 = vpop.f32.mrf.mxu1 }
 0x1b5   : > { %v676_v52 = vpack.c.bf16 %v661_v49, %v660_v48  ;;  %v614_v55 = vadd.f32 %v947_v39, %v613_v51  ;;  %v666_v0 = vmax.f32 %v622_v57, 0.0 }
 0x1b6   : > { %v1058_v54 = vpop.f32.mrf.mxu1 }
 0x1b7   : > { %v625_v56 = vadd.f32 %v1058_v54, %v947_v39  ;;  %1083 = vmatprep.mubr.bf16.mxu0 %v676_v52  ;;  %v664_v62 = vmax.f32 %v614_v55, 0.0 }
 0x1b8   : > { %v616_v58 = vpop.f32.mrf.mxu1  ;;  %1084 = vmatmul.mubr.bf16.vlgmr.msra.gmra.mxu0 %v677_v53 }
 0x1b9   : > { %v617_v59 = vadd.f32 %v947_v39, %v616_v58  ;;  %v667_v60 = vmax.f32 %v625_v56, 0.0 }
 0x1ba   : > { %v1061_v61 = vpop.f32.mrf.mxu1 }
 0x1bb   : > { %v665_v63 = vmax.f32 %v617_v59, 0.0  ;;  %v679_v3 = vpack.c.bf16 %v667_v60, %v666_v0  ;;  %v638_v7 = vadd.f32 %v1061_v61, %v947_v39 }
 0x1bc   : > { %v629_v1 = vpop.f32.mrf.mxu1 }
 0x1bd   : > { %v678_v2 = vpack.c.bf16 %v665_v63, %v664_v62  ;;  %v630_v5 = vadd.f32 %v947_v39, %v629_v1  ;;  %v670_v14 = vmax.f32 %v638_v7, 0.0 }
 0x1be   : > { %v1062_v4 = vpop.f32.mrf.mxu1 }
 0x1bf   : > { %v641_v6 = vadd.f32 %v1062_v4, %v947_v39  ;;  %1087 = vmatprep.mubr.bf16.mxu0 %v678_v2  ;;  %v668_v12 = vmax.f32 %v630_v5, 0.0 }
 0x1c0   : > { %v632_v8 = vpop.f32.mrf.mxu1  ;;  %1088 = vmatmul.mubr.bf16.gmra.mxu0 %v679_v3 }
 0x1c1   : > { %v633_v9 = vadd.f32 %v947_v39, %v632_v8  ;;  %v671_v10 = vmax.f32 %v641_v6, 0.0 }
 0x1c2   : > { %v1065_v11 = vpop.f32.mrf.mxu1 }
 0x1c3   : > { %v669_v13 = vmax.f32 %v633_v9, 0.0  ;;  %v681_v17 = vpack.c.bf16 %v671_v10, %v670_v14  ;;  %v654_v21 = vadd.f32 %v1065_v11, %v947_v39 }
 0x1c4   : > { %v645_v15 = vpop.f32.mrf.mxu1 }
 0x1c5   : > { %v680_v16 = vpack.c.bf16 %v669_v13, %v668_v12  ;;  %v646_v19 = vadd.f32 %v947_v39, %v645_v15  ;;  %v674_v27 = vmax.f32 %v654_v21, 0.0 }
 0x1c6   : > { %v1066_v18 = vpop.f32.mrf.mxu1 }
 0x1c7   : > { %v657_v20 = vadd.f32 %v1066_v18, %v947_v39  ;;  %1091 = vmatprep.mubr.bf16.mxu0 %v680_v16  ;;  %v672_v25 = vmax.f32 %v646_v19, 0.0 }
 0x1c8   : > { %v648_v22 = vpop.f32.mrf.mxu1  ;;  %1092 = vmatmul.mubr.bf16.gmra.mxu0 %v681_v17 }
 0x1c9   : > { %v649_v23 = vadd.f32 %v947_v39, %v648_v22  ;;  %v675_v24 = vmax.f32 %v657_v20, 0.0 }
 0x1cb   : > { %v673_v26 = vmax.f32 %v649_v23, 0.0  ;;  %v683_v29 = vpack.c.bf16 %v675_v24, %v674_v27 }
 0x1cd   : > { %v682_v28 = vpack.c.bf16 %v673_v26, %v672_v25 }
 0x1cf   : > { %1095 = vmatprep.mubr.bf16.mxu1 %v682_v28 }
 0x1d0   : > { %1096 = vmatmul.mubr.bf16.vlgmr.msra.gmra.mxu1 %v683_v29 }
 0x278   : > { %v1085_v31 = vpop.f32.mrf.mxu0 }
 0x279   : > { %v798_v32 = vadd.f32 %v1085_v31, %v956_v30 }
 0x27a   : > { %v789_v33 = vpop.f32.mrf.mxu0 }
 0x27b   : > { %855 = vst.msk [vmem:[%s1313_s16 + $0x10] sm:$0xff] %vm852_vm1, %v798_v32  ;;  %v790_v34 = vadd.f32 %v956_v30, %v789_v33 }
 0x27c   : > { %v1086_v35 = vpop.f32.mrf.mxu0 }
 0x27d   : > { %853 = vst.msk [vmem:[%s1313_s16] sm:$0xff] %vm852_vm1, %v790_v34  ;;  %v801_v36 = vadd.f32 %v1086_v35, %v956_v30 }
 0x27e   : > { %v792_v37 = vpop.f32.mrf.mxu0 }
 0x27f   : > { %856 = vst.msk [vmem:[%s1313_s16 + $0x18] sm:$0xff] %vm852_vm1, %v801_v36  ;;  %v793_v38 = vadd.f32 %v956_v30, %v792_v37 }
 0x280   : > { %v1089_v39 = vpop.f32.mrf.mxu0 }
 0x281   : > { %854 = vst.msk [vmem:[%s1313_s16 + $0x8] sm:$0xff] %vm852_vm1, %v793_v38  ;;  %v814_v40 = vadd.f32 %v1089_v39, %v956_v30 }
 0x282   : > { %v805_v41 = vpop.f32.mrf.mxu0 }
 0x283   : > { %859 = vst.msk [vmem:[%s1313_s16 + $0x30] sm:$0xff] %vm852_vm1, %v814_v40  ;;  %v806_v42 = vadd.f32 %v956_v30, %v805_v41 }
 0x284   : > { %v1090_v43 = vpop.f32.mrf.mxu0 }
 0x285   : > { %857 = vst.msk [vmem:[%s1313_s16 + $0x20] sm:$0xff] %vm852_vm1, %v806_v42  ;;  %v817_v44 = vadd.f32 %v1090_v43, %v956_v30 }
 0x286   : > { %v808_v45 = vpop.f32.mrf.mxu0 }
 0x287   : > { %860 = vst.msk [vmem:[%s1313_s16 + $0x38] sm:$0xff] %vm852_vm1, %v817_v44  ;;  %v809_v46 = vadd.f32 %v956_v30, %v808_v45 }
 0x288   : > { %v1093_v47 = vpop.f32.mrf.mxu0 }
 0x289   : > { %858 = vst.msk [vmem:[%s1313_s16 + $0x28] sm:$0xff] %vm852_vm1, %v809_v46  ;;  %v830_v48 = vadd.f32 %v1093_v47, %v956_v30 }
 0x28a   : > { %v821_v49 = vpop.f32.mrf.mxu0 }
 0x28b   : > { %863 = vst.msk [vmem:[%s1313_s16 + $0x50] sm:$0xff] %vm852_vm1, %v830_v48  ;;  %v822_v50 = vadd.f32 %v956_v30, %v821_v49 }
 0x28c   : > { %v1094_v51 = vpop.f32.mrf.mxu0 }
 0x28d   : > { %861 = vst.msk [vmem:[%s1313_s16 + $0x40] sm:$0xff] %vm852_vm1, %v822_v50  ;;  %v833_v52 = vadd.f32 %v1094_v51, %v956_v30 }
 0x28e   : > { %v824_v53 = vpop.f32.mrf.mxu0 }
 0x28f   : > { %864 = vst.msk [vmem:[%s1313_s16 + $0x58] sm:$0xff] %vm852_vm1, %v833_v52  ;;  %v825_v54 = vadd.f32 %v956_v30, %v824_v53 }
 0x290   : > { %v1097_v55 = vpop.f32.mrf.mxu1 }
 0x291   : > { %862 = vst.msk [vmem:[%s1313_s16 + $0x48] sm:$0xff] %vm852_vm1, %v825_v54  ;;  %v846_v56 = vadd.f32 %v1097_v55, %v956_v30 }
 0x292   : > { %v837_v57 = vpop.f32.mrf.mxu1 }
 0x293   : > { %867 = vst.msk [vmem:[%s1313_s16 + $0x70] sm:$0xff] %vm852_vm1, %v846_v56  ;;  %v838_v58 = vadd.f32 %v956_v30, %v837_v57 }
 0x294   : > { %v1098_v59 = vpop.f32.mrf.mxu1 }
 0x295   : > { %865 = vst.msk [vmem:[%s1313_s16 + $0x60] sm:$0xff] %vm852_vm1, %v838_v58  ;;  %v849_v60 = vadd.f32 %v1098_v59, %v956_v30 }
 0x296   : > { %v840_v61 = vpop.f32.mrf.mxu1 }
 0x297   : > { %868 = vst.msk [vmem:[%s1313_s16 + $0x78] sm:$0xff] %vm852_vm1, %v849_v60  ;;  %v841_v62 = vadd.f32 %v956_v30, %v840_v61 }
 0x299   : > { %866 = vst.msk [vmem:[%s1313_s16 + $0x68] sm:$0xff] %vm852_vm1, %v841_v62 }
 0x29a PF: > { %s17_s24 = sadd.s32 1, %s1149_s24  }
 0x29b   : > { %p14_p4 = scmp.ge.s32.totalorder %s17_s24, 4  }
 0x29d   :  { %16 = sbr.rel (!%p14_p4) target bundleno = 1 (0x1), region = 78 }

</bundles_post_ra>
